<compile_context>
chip_gen: v6e
topology: v6e:2x2x1
jax: 0.10.0
libtpu: 0.0.40
codegen_flags: <defaults>
</compile_context>

<pallas_src>
from functools import partial

import jax
import jax.numpy as jnp
from jax import lax
from jax.experimental import pallas as pl
from jax.experimental.pallas import tpu as pltpu


# ----------------------------------------------------------------------------
# One-time device probes (tiny kernels; cached).
# ----------------------------------------------------------------------------
_ROLL_MATCHES_JNP = None


def _roll_matches_jnp():
    """pltpu.roll follows jnp.roll (out[i] = in[i - shift]) on current JAX;
    probe it once on the device so the 3x3 tap construction is convention-proof."""
    global _ROLL_MATCHES_JNP
    if _ROLL_MATCHES_JNP is None:
        def probe(x_ref, o_ref):
            o_ref[...] = pltpu.roll(x_ref[...], shift=1, axis=0)

        x = jnp.broadcast_to(jnp.arange(8, dtype=jnp.float32)[:, None], (8, 128))
        y = pl.pallas_call(
            probe, out_shape=jax.ShapeDtypeStruct((8, 128), jnp.float32))(x)
        _ROLL_MATCHES_JNP = bool(y[0, 0] == 7.0)   # jnp.roll(arange(8), 1)[0] == 7
    return _ROLL_MATCHES_JNP


_BUFFERED1_OK = None


def _buffered1_supported():
    """Probe whether this JAX build accepts pipeline_mode=pl.Buffered(1) on a
    grid-invariant BlockSpec.  Probing on a throwaway kernel keeps the real
    pallas_call free of a blanket try/except that could mask genuine runtime
    failures (e.g. VMEM OOM) by silently re-running double-buffered."""
    global _BUFFERED1_OK
    if _BUFFERED1_OK is None:
        try:
            def probe(c_ref, x_ref, o_ref):
                o_ref[...] = x_ref[...] + c_ref[...]

            c = jnp.ones((1, 128), jnp.float32)
            x = jnp.zeros((8, 128), jnp.float32)
            y = pl.pallas_call(
                probe,
                out_shape=jax.ShapeDtypeStruct((8, 128), jnp.float32),
                grid_spec=pltpu.PrefetchScalarGridSpec(
                    num_scalar_prefetch=0,
                    grid=(1,),
                    in_specs=[
                        pl.BlockSpec((1, 128), lambda n: (0, 0),
                                     pipeline_mode=pl.Buffered(1)),
                        pl.BlockSpec((8, 128), lambda n: (0, 0)),
                    ],
                    out_specs=pl.BlockSpec((8, 128), lambda n: (0, 0)),
                ),
            )(c, x)
            jax.block_until_ready(y)
            _BUFFERED1_OK = True
        except Exception:   # probe only; the real call below is unguarded
            _BUFFERED1_OK = False
    return _BUFFERED1_OK


# ----------------------------------------------------------------------------
# Kernel
# ----------------------------------------------------------------------------
def bottleneck_kernel(x_ref, s1_ref, b1_ref, w1_ref, b2_ref, w2_ref,
                      b3_ref, w3_ref, out_ref, *, H, W, roll_fwd):
    HW = H * W
    f32 = jnp.float32
    bf16 = jnp.bfloat16

    def shift_rows(x, k):
        # out[i] = x[(i - k) % HW] along the flattened-spatial (sublane) axis.
        amt = k % HW if roll_fwd else (-k) % HW
        return pltpu.roll(x, shift=amt, axis=0)

    # ---- bn1 + ReLU (f32); conv1 as 1x1 channel matmul (bf16 in, f32 acc) --
    # BN2's scale is pre-folded into w1's output columns; only +shift remains.
    h = jnp.maximum(x_ref[0].astype(f32) * s1_ref[...] + b1_ref[...], 0.0)
    h = jnp.dot(h.astype(bf16), w1_ref[...], preferred_element_type=f32)   # (HW, P)
    h = jnp.maximum(h + b2_ref[...], 0.0)                                  # bn2 + ReLU

    # ---- conv2: 3x3, stride 1, SAME padding --------------------------------
    # Nine shifted taps via XLU rotations + (HW, 1) edge masks; each tap cast
    # to bf16 and packed along channels into one (HW, 9P) slab -> one MXU
    # matmul with K = 9*planes.  BN3's scale is pre-folded into w2.
    flat = lax.broadcasted_iota(jnp.int32, (HW, 1), 0)     # flat spatial index
    col = flat % W                                          # x position
    row_ok = {-1: flat >= W, 0: None, 1: flat < (HW - W)}   # y-1 / y / y+1 valid
    col_ok = {-1: col > 0, 0: None, 1: col < (W - 1)}       # x-1 / x / x+1 valid

    taps = []
    for dy in (-1, 0, 1):
        for dx in (-1, 0, 1):
            k = dy * W + dx
            v = h if k == 0 else shift_rows(h, -k)          # v[i] = h[i + k]
            m = None
            for part in (row_ok[dy], col_ok[dx]):
                if part is not None:
                    m = part if m is None else (m & part)
            if m is not None:
                v = jnp.where(m, v, 0.0)                    # SAME-padding zeros
            taps.append(v.astype(bf16))
    slab = jnp.concatenate(taps, axis=-1)                   # (HW, 9P) bf16
    h = jnp.dot(slab, w2_ref[...], preferred_element_type=f32)   # (HW, P)
    h = jnp.maximum(h + b3_ref[...], 0.0)                        # bn3 + ReLU

    # ---- conv3 (1x1) + residual (re-read the VMEM input block) -------------
    out = jnp.dot(h.astype(bf16), w3_ref[...], preferred_element_type=f32)
    out_ref[0] = (out + x_ref[0].astype(f32)).astype(out_ref.dtype)


# ----------------------------------------------------------------------------
# Wrapper
# ----------------------------------------------------------------------------
def bottleneck_forward(x_nchw, params, *, planes):
    """x_nchw: (N, C, H, W) with C == 4 * planes. Returns NCHW output."""
    s1, b1, w1, s2, b2, w2, s3, b3, w3 = params        # weights in f32
    N, C, H, W = x_nchw.shape
    HW = H * W
    assert C == 4 * planes, "residual add requires inplanes == 4 * planes"
    # W % 8 == 0 keeps rotates/stores 8-sublane aligned (perf, not correctness).

    # NCHW -> NHWC -> (N, HW, C); channels ride the lane axis.
    x_flat = jnp.transpose(x_nchw, (0, 2, 3, 1)).reshape(N, HW, C)

    # Fold BN2/BN3 scales into the preceding conv weights (f32 fold, then bf16
    # cast): dot(x, w) * s == dot(x, w * s).  w2 is packed (9, P, P)->(9P, P)
    # so its row blocks line up with the slab's [dy, dx]-ordered taps.
    w1f = (w1.astype(jnp.float32) * s2[None, :]).astype(jnp.bfloat16)
    w2f = (w2.astype(jnp.float32) * s3[None, None, :]
           ).reshape(9 * planes, planes).astype(jnp.bfloat16)
    w3f = w3.astype(jnp.bfloat16)

    args = (x_flat,
            s1.reshape(1, -1), b1.reshape(1, -1), w1f,
            b2.reshape(1, -1), w2f,
            b3.reshape(1, -1), w3f)

    kernel = partial(bottleneck_kernel, H=H, W=W, roll_fwd=_roll_matches_jnp())

    const_kwargs = (dict(pipeline_mode=pl.Buffered(1))
                    if _buffered1_supported() else {})

    def const_spec(shape):
        # Grid-invariant operand: same block every step -> single buffer.
        return pl.BlockSpec(shape, lambda n: (0,) * len(shape), **const_kwargs)

    call = pl.pallas_call(
        kernel,
        out_shape=jax.ShapeDtypeStruct((N, HW, C), x_nchw.dtype),
        grid_spec=pltpu.PrefetchScalarGridSpec(
            num_scalar_prefetch=0,
            grid=(N,),
            in_specs=[
                pl.BlockSpec((1, HW, C), lambda n: (n, 0, 0)),   # x
                const_spec((1, C)),                              # bn1 scale
                const_spec((1, C)),                              # bn1 shift
                const_spec((C, planes)),                         # conv1 w * s2 (bf16)
                const_spec((1, planes)),                         # bn2 shift
                const_spec((9 * planes, planes)),                # conv2 w * s3 (bf16)
                const_spec((1, planes)),                         # bn3 shift
                const_spec((planes, C)),                         # conv3 w (bf16)
            ],
            out_specs=pl.BlockSpec((1, HW, C), lambda n: (n, 0, 0)),
        ),
        compiler_params=pltpu.CompilerParams(
            dimension_semantics=("parallel",),   # batch steps are independent
            vmem_limit_bytes=32 * 1024 * 1024,
        ),
    )
    out_flat = call(*args)
    return jnp.transpose(out_flat.reshape(N, H, W, C), (0, 3, 1, 2))


# ----------------------------------------------------------------------------
# Params + pure-JAX reference
# ----------------------------------------------------------------------------
def init_params(key, inplanes, planes, eps=1e-5):
    """Deterministic synthetic params; BN folded into (scale, shift); f32 weights
    (the wrapper does the scale-fold and bf16 cast)."""
    ks = jax.random.split(key, 6)

    def bn(k, c):
        kg, kb, km, kv = jax.random.split(k, 4)
        gamma = 1.0 + 0.1 * jax.random.normal(kg, (c,), jnp.float32)
        beta = 0.1 * jax.random.normal(kb, (c,), jnp.float32)
        mean = 0.1 * jax.random.normal(km, (c,), jnp.float32)
        var = 1.0 + 0.1 * jnp.abs(jax.random.normal(kv, (c,), jnp.float32))
        scale = gamma * lax.rsqrt(var + eps)
        shift = beta - mean * scale
        return scale, shift

    s1, b1 = bn(ks[0], inplanes)
    w1 = 0.1 * jax.random.normal(ks[1], (inplanes, planes), jnp.float32)
    s2, b2 = bn(ks[2], planes)
    w2 = 0.1 * jax.random.normal(ks[3], (9, planes, planes), jnp.float32)
    s3, b3 = bn(ks[4], planes)
    w3 = 0.1 * jax.random.normal(ks[5], (planes, 4 * planes), jnp.float32)
    return (s1, b1, w1, s2, b2, w2, s3, b3, w3)


def reference_forward(x_nchw, params):
    """Plain-JAX reference matching the module forward (unfolded BN) with the
    kernel's mixed-precision policy (bf16 matmul inputs, f32 accumulation,
    f32 BN/ReLU).  Deliberately does NOT fold s2/s3 into the weights, so the
    comparison also validates the fold performed in the wrapper."""
    s1, b1, w1, s2, b2, w2, s3, b3, w3 = params
    f32 = jnp.float32
    bf16 = jnp.bfloat16
    x = jnp.transpose(x_nchw, (0, 2, 3, 1)).astype(f32)              # NHWC
    h = jnp.maximum(x * s1 + b1, 0.0)
    h = jnp.einsum('nhwc,cp->nhwp', h.astype(bf16), w1.astype(bf16),
                   preferred_element_type=f32)
    h = jnp.maximum(h * s2 + b2, 0.0)
    w2_hwio = w2.reshape(3, 3, w2.shape[1], w2.shape[2]).astype(bf16)
    h = lax.conv_general_dilated(h.astype(bf16), w2_hwio,
                                 window_strides=(1, 1), padding='SAME',
                                 dimension_numbers=('NHWC', 'HWIO', 'NHWC'),
                                 preferred_element_type=f32)
    h = jnp.maximum(h * s3 + b3, 0.0)
    out = jnp.einsum('nhwp,pc->nhwc', h.astype(bf16), w3.astype(bf16),
                     preferred_element_type=f32) + x
    return jnp.transpose(out, (0, 3, 1, 2))                          # NCHW


if __name__ == "__main__":
    planes = 64                    # realistic channel counts: C = 256 (lane-aligned)
    inplanes = 4 * planes          # residual add requires inplanes == 4 * planes
    N, H, W = 2, 16, 16

    key = jax.random.PRNGKey(0)
    kx, kp = jax.random.split(key)
    x = jax.random.normal(kx, (N, inplanes, H, W), jnp.float32)      # NCHW like PyTorch
    params = init_params(kp, inplanes, planes)

    out = bottleneck_forward(x, params, planes=planes)
    out = jax.block_until_ready(out)

    ref = reference_forward(x, params)
    assert out.shape == ref.shape == (N, inplanes, H, W)
    max_err = float(jnp.max(jnp.abs(out - ref)))
    # Tolerance covers bf16 matmul inputs plus the f32 fold of BN2/BN3 scales
    # into w1/w2 (which rounds to bf16 differently than the reference's
    # unfolded weights).
    assert jnp.allclose(out, ref, atol=3e-2, rtol=3e-2), max_err

    print("KERNEL_OK")
</pallas_src>

<mosaic_0001>
module attributes {stable_mosaic.version = 11 : i64} {
  func.func @probe(%arg0: memref<8x128xf32, #tpu.memory_space<vmem>>, %arg1: memref<8x128xf32, #tpu.memory_space<vmem>>) attributes {dimension_semantics = [], scalar_prefetch = 0 : i64, scratch_operands = 0 : i64, tpu.core_type = #tpu.core_type<tc>} {
    %c0 = arith.constant 0 : index
    %c0_0 = arith.constant 0 : index
    %0 = vector.load %arg0[%c0, %c0_0] : memref<8x128xf32, #tpu.memory_space<vmem>>, vector<8x128xf32>
    %c1_i32 = arith.constant 1 : i32
    %1 = tpu.dynamic_rotate %0 by %c1_i32 dim 0 : vector<8x128xf32>, i32 -> vector<8x128xf32>
    %c0_1 = arith.constant 0 : index
    %c0_2 = arith.constant 0 : index
    %2 = vector.load %arg1[%c0_1, %c0_2] : memref<8x128xf32, #tpu.memory_space<vmem>>, vector<8x128xf32>
    tpu.vector_store %arg1[%c0_1, %c0_2], %1 {strides = array<i32>} : memref<8x128xf32, #tpu.memory_space<vmem>>, vector<8x128xf32>,
    return
  }
}

</mosaic_0001>

<bundles_post_ra>
// kernel: tpu_custom_call.1
= control target key start
LH: loop header
LB: loop body
LE: loop exit
PB: predicated region body
PF: predicated region fallthrough
CT: control target
= control target key end

     0   :  { %6 = vsyncpa [#allocation3], 0  ;;  %s103_s0 = inlined_call_operand.hbm [shape: f32[8,128], index: 0, kind: input, shape index: {}]   ;;  %s104_s1 = inlined_call_operand.hbm [shape: f32[8,128], index: 1, kind: output, shape index: {}]  }
   0x1   :  { %7 = vsyncpa [#allocation4], 0  ;;  %s85_s6 = smov [#allocation2]  }
   0x2   :  { %s14_s7 = sshll.u32 %s85_s6, 4  ;;  %s15_s7 = int_to_ptr.vmem [resolvable:$true] %s14_s7 }
   0x3   :  { %s49_s8 = scalar_lea.vmem %s15_s7, 128  ;;  %p54_p1 = scmp.lt.s32.totalorder %s15_s7, %s15_s7 }
   0x4   :  { %p50_p0 = scmp.ne.s32.totalorder %s15_s7, %s49_s8  ;;  %p55_p2 = scmp.lt.s32.totalorder %s49_s8, %s49_s8 }
   0x6   :  { %p56_p3 = por %p55_p2, %p54_p1 }
   0x8   :  { %p57_p4 = pnand %p56_p3, %p50_p0 }
   0xa   :  { %60 = shalt.err (!%p57_p4)
}
   0xb   :  { %17 = dma.hbm_to_vmem [thread:$0]  %s103_s0, 128, %s15_s7, [#allocation3]  }
   0xc   :  { %81 = dma.done.wait [#allocation3], 128  }
   0xd   :  { %82 = vsyncadd [#allocation3], 4294967168  ;;  %s86_s11 = smov [#allocation5]   ;;  %v21_v0 = vld [vmem:[#allocation2] sm:$0xff] }
   0xe   :  { %s30_s12 = sshll.u32 %s86_s11, 4  ;;  %v22_v1 = vrot.slane %v21_v0, 7  ;;  %s31_s12 = int_to_ptr.vmem [resolvable:$true] %s30_s12 }
   0xf   :  { %s61_s13 = scalar_lea.vmem %s31_s12, 128  ;;  %p66_p6 = scmp.lt.s32.totalorder %s31_s12, %s31_s12 }
  0x10   :  { %23 = vst [vmem:[#allocation5] sm:$0xff] %v22_v1  ;;  %p62_p5 = scmp.ne.s32.totalorder %s31_s12, %s61_s13  ;;  %p67_p7 = scmp.lt.s32.totalorder %s61_s13, %s61_s13 }
  0x12   :  { %p68_p8 = por %p67_p7, %p66_p6 }
  0x14   :  { %p69_p9 = pnand %p68_p8, %p62_p5 }
  0x16   :  { %72 = shalt.err (!%p69_p9)
}
  0x17   :  { %33 = dma.vmem_to_hbm [thread:$0]  %s31_s12, 128, %s104_s1, [#allocation4]  }
  0x18   :  { %83 = dma.done.wait [#allocation4], 128  }
  0x19   :  { %84 = vsyncadd [#allocation4], 4294967168 }
  0x1a   :  { %37 = vsyncpa [#allocation3], 1 }
  0x1b   :  { %38 = vsyncpa [#allocation4], 1 }

</bundles_post_ra>
